<compile_context>
chip_gen: v6e
topology: v6e:2x2x1
jax: 0.10.0
libtpu: 0.0.40
codegen_flags: <defaults>
</compile_context>

<pallas_src>
import jax
import jax.numpy as jnp
from jax.experimental import pallas as pl
from jax.experimental.pallas import tpu as pltpu


def _embedding_kernel(label_ref, table_ref, out_ref):
    # label_ref: (B,)   int32   in SMEM  (scalar index memory)
    # table_ref: (V, D) float32 in VMEM
    # out_ref:   (B, D) float32 in VMEM
    B = out_ref.shape[0]
    V = table_ref.shape[0]
    # B is small and static -> unrolled Python loop; each iteration is one
    # scalar SMEM read, one dynamic-start VMEM row load, and one row store.
    for b in range(B):
        lab = jnp.clip(label_ref[b], 0, V - 1)          # guard OOB (no HW check)
        out_ref[pl.ds(b, 1), :] = table_ref[pl.ds(lab, 1), :]


def embedding_lookup(label, table):
    """Pallas equivalent of nn.Embedding(V, D) applied to integer labels."""
    B = label.shape[0]
    V, D = table.shape
    return pl.pallas_call(
        _embedding_kernel,
        out_shape=jax.ShapeDtypeStruct((B, D), table.dtype),
        in_specs=[
            pl.BlockSpec(memory_space=pltpu.MemorySpace.SMEM),  # labels: scalar memory
            pl.BlockSpec(memory_space=pltpu.MemorySpace.VMEM),  # table: vector memory
        ],
        out_specs=pl.BlockSpec(memory_space=pltpu.MemorySpace.VMEM),
    )(label.astype(jnp.int32), table)


if __name__ == "__main__":
    key = jax.random.PRNGKey(0)
    k_table, k_label = jax.random.split(key)

    # Deterministic parameter init, matching nn.Embedding(10, 10) default N(0, 1).
    num_embeddings, embedding_dim = 10, 10
    emb_table = jax.random.normal(
        k_table, (num_embeddings, embedding_dim), dtype=jnp.float32
    )

    # Small batch of integer class labels (what the GAN forward pass consumes).
    batch = 8
    labels = jax.random.randint(k_label, (batch,), 0, num_embeddings, dtype=jnp.int32)

    out = embedding_lookup(labels, emb_table)
    out = jax.block_until_ready(out)

    # Correctness check against the plain-JAX reference gather.
    ref = jnp.take(emb_table, labels, axis=0)
    assert out.shape == (batch, embedding_dim)
    assert jnp.allclose(out, ref, atol=1e-6), "mismatch vs reference embedding lookup"

    print("KERNEL_OK")
</pallas_src>

<mosaic_0001>
module attributes {stable_mosaic.version = 11 : i64} {
  func.func @_embedding_kernel(%arg0: memref<8xi32, #tpu.memory_space<smem>>, %arg1: memref<10x10xf32, #tpu.memory_space<vmem>>, %arg2: memref<8x10xf32, #tpu.memory_space<vmem>>) attributes {dimension_semantics = [], scalar_prefetch = 0 : i64, scratch_operands = 0 : i64, tpu.core_type = #tpu.core_type<tc>} {
    %c0 = arith.constant 0 : index
    %0 = memref.load %arg0[%c0] : memref<8xi32, #tpu.memory_space<smem>>
    %c0_i32 = arith.constant 0 : i32
    %c9_i32 = arith.constant 9 : i32
    %1 = arith.maxsi %c0_i32, %0 : i32
    %2 = arith.minsi %c9_i32, %1 : i32
    %3 = arith.index_cast %2 : i32 to index
    %c0_0 = arith.constant 0 : index
    %4 = vector.load %arg1[%3, %c0_0] : memref<10x10xf32, #tpu.memory_space<vmem>>, vector<1x10xf32>
    %c0_1 = arith.constant 0 : index
    %c0_2 = arith.constant 0 : index
    %5 = vector.load %arg2[%c0_1, %c0_2] : memref<8x10xf32, #tpu.memory_space<vmem>>, vector<1x10xf32>
    tpu.vector_store %arg2[%c0_1, %c0_2], %4 {strides = array<i32>} : memref<8x10xf32, #tpu.memory_space<vmem>>, vector<1x10xf32>,
    %c1 = arith.constant 1 : index
    %6 = memref.load %arg0[%c1] : memref<8xi32, #tpu.memory_space<smem>>
    %c0_i32_3 = arith.constant 0 : i32
    %c9_i32_4 = arith.constant 9 : i32
    %7 = arith.maxsi %c0_i32_3, %6 : i32
    %8 = arith.minsi %c9_i32_4, %7 : i32
    %9 = arith.index_cast %8 : i32 to index
    %c0_5 = arith.constant 0 : index
    %10 = vector.load %arg1[%9, %c0_5] : memref<10x10xf32, #tpu.memory_space<vmem>>, vector<1x10xf32>
    %c1_6 = arith.constant 1 : index
    %c0_7 = arith.constant 0 : index
    %11 = vector.load %arg2[%c1_6, %c0_7] : memref<8x10xf32, #tpu.memory_space<vmem>>, vector<1x10xf32>
    tpu.vector_store %arg2[%c1_6, %c0_7], %10 {strides = array<i32>} : memref<8x10xf32, #tpu.memory_space<vmem>>, vector<1x10xf32>,
    %c2 = arith.constant 2 : index
    %12 = memref.load %arg0[%c2] : memref<8xi32, #tpu.memory_space<smem>>
    %c0_i32_8 = arith.constant 0 : i32
    %c9_i32_9 = arith.constant 9 : i32
    %13 = arith.maxsi %c0_i32_8, %12 : i32
    %14 = arith.minsi %c9_i32_9, %13 : i32
    %15 = arith.index_cast %14 : i32 to index
    %c0_10 = arith.constant 0 : index
    %16 = vector.load %arg1[%15, %c0_10] : memref<10x10xf32, #tpu.memory_space<vmem>>, vector<1x10xf32>
    %c2_11 = arith.constant 2 : index
    %c0_12 = arith.constant 0 : index
    %17 = vector.load %arg2[%c2_11, %c0_12] : memref<8x10xf32, #tpu.memory_space<vmem>>, vector<1x10xf32>
    tpu.vector_store %arg2[%c2_11, %c0_12], %16 {strides = array<i32>} : memref<8x10xf32, #tpu.memory_space<vmem>>, vector<1x10xf32>,
    %c3 = arith.constant 3 : index
    %18 = memref.load %arg0[%c3] : memref<8xi32, #tpu.memory_space<smem>>
    %c0_i32_13 = arith.constant 0 : i32
    %c9_i32_14 = arith.constant 9 : i32
    %19 = arith.maxsi %c0_i32_13, %18 : i32
    %20 = arith.minsi %c9_i32_14, %19 : i32
    %21 = arith.index_cast %20 : i32 to index
    %c0_15 = arith.constant 0 : index
    %22 = vector.load %arg1[%21, %c0_15] : memref<10x10xf32, #tpu.memory_space<vmem>>, vector<1x10xf32>
    %c3_16 = arith.constant 3 : index
    %c0_17 = arith.constant 0 : index
    %23 = vector.load %arg2[%c3_16, %c0_17] : memref<8x10xf32, #tpu.memory_space<vmem>>, vector<1x10xf32>
    tpu.vector_store %arg2[%c3_16, %c0_17], %22 {strides = array<i32>} : memref<8x10xf32, #tpu.memory_space<vmem>>, vector<1x10xf32>,
    %c4 = arith.constant 4 : index
    %24 = memref.load %arg0[%c4] : memref<8xi32, #tpu.memory_space<smem>>
    %c0_i32_18 = arith.constant 0 : i32
    %c9_i32_19 = arith.constant 9 : i32
    %25 = arith.maxsi %c0_i32_18, %24 : i32
    %26 = arith.minsi %c9_i32_19, %25 : i32
    %27 = arith.index_cast %26 : i32 to index
    %c0_20 = arith.constant 0 : index
    %28 = vector.load %arg1[%27, %c0_20] : memref<10x10xf32, #tpu.memory_space<vmem>>, vector<1x10xf32>
    %c4_21 = arith.constant 4 : index
    %c0_22 = arith.constant 0 : index
    %29 = vector.load %arg2[%c4_21, %c0_22] : memref<8x10xf32, #tpu.memory_space<vmem>>, vector<1x10xf32>
    tpu.vector_store %arg2[%c4_21, %c0_22], %28 {strides = array<i32>} : memref<8x10xf32, #tpu.memory_space<vmem>>, vector<1x10xf32>,
    %c5 = arith.constant 5 : index
    %30 = memref.load %arg0[%c5] : memref<8xi32, #tpu.memory_space<smem>>
    %c0_i32_23 = arith.constant 0 : i32
    %c9_i32_24 = arith.constant 9 : i32
    %31 = arith.maxsi %c0_i32_23, %30 : i32
    %32 = arith.minsi %c9_i32_24, %31 : i32
    %33 = arith.index_cast %32 : i32 to index
    %c0_25 = arith.constant 0 : index
    %34 = vector.load %arg1[%33, %c0_25] : memref<10x10xf32, #tpu.memory_space<vmem>>, vector<1x10xf32>
    %c5_26 = arith.constant 5 : index
    %c0_27 = arith.constant 0 : index
    %35 = vector.load %arg2[%c5_26, %c0_27] : memref<8x10xf32, #tpu.memory_space<vmem>>, vector<1x10xf32>
    tpu.vector_store %arg2[%c5_26, %c0_27], %34 {strides = array<i32>} : memref<8x10xf32, #tpu.memory_space<vmem>>, vector<1x10xf32>,
    %c6 = arith.constant 6 : index
    %36 = memref.load %arg0[%c6] : memref<8xi32, #tpu.memory_space<smem>>
    %c0_i32_28 = arith.constant 0 : i32
    %c9_i32_29 = arith.constant 9 : i32
    %37 = arith.maxsi %c0_i32_28, %36 : i32
    %38 = arith.minsi %c9_i32_29, %37 : i32
    %39 = arith.index_cast %38 : i32 to index
    %c0_30 = arith.constant 0 : index
    %40 = vector.load %arg1[%39, %c0_30] : memref<10x10xf32, #tpu.memory_space<vmem>>, vector<1x10xf32>
    %c6_31 = arith.constant 6 : index
    %c0_32 = arith.constant 0 : index
    %41 = vector.load %arg2[%c6_31, %c0_32] : memref<8x10xf32, #tpu.memory_space<vmem>>, vector<1x10xf32>
    tpu.vector_store %arg2[%c6_31, %c0_32], %40 {strides = array<i32>} : memref<8x10xf32, #tpu.memory_space<vmem>>, vector<1x10xf32>,
    %c7 = arith.constant 7 : index
    %42 = memref.load %arg0[%c7] : memref<8xi32, #tpu.memory_space<smem>>
    %c0_i32_33 = arith.constant 0 : i32
    %c9_i32_34 = arith.constant 9 : i32
    %43 = arith.maxsi %c0_i32_33, %42 : i32
    %44 = arith.minsi %c9_i32_34, %43 : i32
    %45 = arith.index_cast %44 : i32 to index
    %c0_35 = arith.constant 0 : index
    %46 = vector.load %arg1[%45, %c0_35] : memref<10x10xf32, #tpu.memory_space<vmem>>, vector<1x10xf32>
    %c7_36 = arith.constant 7 : index
    %c0_37 = arith.constant 0 : index
    %47 = vector.load %arg2[%c7_36, %c0_37] : memref<8x10xf32, #tpu.memory_space<vmem>>, vector<1x10xf32>
    tpu.vector_store %arg2[%c7_36, %c0_37], %46 {strides = array<i32>} : memref<8x10xf32, #tpu.memory_space<vmem>>, vector<1x10xf32>,
    return
  }
}

</mosaic_0001>

<bundles_post_ra>
// kernel: tpu_custom_call.1
= control target key start
LH: loop header
LB: loop body
LE: loop exit
PB: predicated region body
PF: predicated region fallthrough
CT: control target
= control target key end

     0   :  { %7 = vsyncpa [#allocation5], 0  ;;  %s295_s0 = inlined_call_operand.hbm [shape: s32[8], index: 0, kind: input, shape index: {}]   ;;  %s296_s1 = inlined_call_operand.hbm [shape: f32[10,10], index: 1, kind: input, shape index: {}]   ;;  %s297_s2 = inlined_call_operand.hbm [shape: f32[8,10], index: 2, kind: output, shape index: {}]  }
   0x1   :  { %8 = vsyncpa [#allocation3], 0 }
   0x2   :  { %9 = vsyncpa [#allocation4], 0  ;;  %s248_s9 = smov [#allocation2]   ;;  %s249_s12 = smov [#allocation6]  }
   0x3   :  { %17 = dma.hbm_to_smem %s295_s0, 16, %s248_s9, [#allocation5]  }
   0x4   :  { %s23_s13 = sshll.u32 %s249_s12, 4  ;;  %s24_s13 = int_to_ptr.vmem [resolvable:$true] %s23_s13 }
   0x5   :  { %s210_s14 = scalar_lea.vmem %s24_s13, 256  ;;  %p215_p1 = scmp.lt.s32.totalorder %s24_s13, %s24_s13 }
   0x6   :  { %p211_p0 = scmp.ne.s32.totalorder %s24_s13, %s210_s14  ;;  %p216_p2 = scmp.lt.s32.totalorder %s210_s14, %s210_s14 }
   0x8   :  { %p217_p3 = por %p216_p2, %p215_p1 }
   0xa   :  { %p218_p4 = pnand %p217_p3, %p211_p0 }
   0xc   :  { %221 = shalt.err (!%p218_p4)
}
   0xd   :  { %s250_s15 = smov 128   ;;  %s251_s16 = smov 8  }
   0xe   :  { %29 = dma.hbm_to_vmem [thread:$0]  %s296_s1, 256, %s24_s13, [#allocation3], %s250_s15, %s250_s15, %s251_s16  }
   0xf   :  { %242 = dma.done.wait [#allocation5], 16  }
  0x10   :  { %243 = vsyncadd [#allocation5], 4294967280 }
  0x11   :  { %244 = dma.done.wait [#allocation3], 256  }
  0x12   :  { %245 = vsyncadd [#allocation3], 4294967040 }
  0x13   :  { %36 = sfence }
  0x14   :  { %s37_s0 = sld [smem:[#allocation2]]  ;;  %vm44_vm0 = vcmask 73728   ;;  %s252_s4 = smov [#allocation7]  }
  0x15   :  { %s131_s19 = sld [smem:[#allocation2 + $0x1]]  ;;  %s108_s5 = sshll.u32 %s252_s4, 4  ;;  %s109_s5 = int_to_ptr.vmem [resolvable:$true] %s108_s5 }
  0x16   :  { %s137_s20 = sld [smem:[#allocation2 + $0x2]]  ;;  %s222_s8 = scalar_lea.vmem %s109_s5, 128 }
  0x17   :  { %s143_s21 = sld [smem:[#allocation2 + $0x3]] }
  0x18   :  { %s274_s22 = sld [smem:[#allocation2 + $0x4]] }
  0x19   :  { %s276_s23 = sld [smem:[#allocation2 + $0x5]] }
  0x1a   :  { %p38_p5 = scmp.gt.s32.totalorder %s37_s0, 0  ;;  %p126_p6 = scmp.lt.s32.totalorder %s37_s0, 9 }
  0x1b   :  { %p47_p7 = scmp.gt.s32.totalorder %s131_s19, 0  ;;  %p132_p8 = scmp.lt.s32.totalorder %s131_s19, 9 }
  0x1c   :  { %s299_s0 = smov (!%p38_p5, %s37_s0), 0  ;;  %p55_p9 = scmp.gt.s32.totalorder %s137_s20, 0 }
  0x1d   :  { %s301_s19 = smov (!%p47_p7, %s131_s19), 0  ;;  %s303_s0 = smov (!%p126_p6, %s299_s0), 9 }
  0x1e   :  { %s305_s19 = smov (!%p132_p8, %s301_s19), 9  ;;  %s42_s1 = scalar_lea.vmem [#allocation6], %s303_s0 }
  0x1f   :  { %v43_v0 = vld [vmem:[%s42_s1] sm:$0x1]  ;;  %p138_p10 = scmp.lt.s32.totalorder %s137_s20, 9  ;;  %s51_s24 = scalar_lea.vmem [#allocation6], %s305_s19 }
  0x20   :  { %45 = vst.msk [vmem:[#allocation7] sm:$0x1] %vm44_vm0, %v43_v0  ;;  %v52_v1 = vld [vmem:[%s51_s24] sm:$0x1]  ;;  %s307_s20 = smov (!%p55_p9, %s137_s20), 0  ;;  %p63_p11 = scmp.gt.s32.totalorder %s143_s21, 0 }
  0x21   :  { %53 = vst.msk [vmem:[#allocation7 + $0x1] sm:$0x1] %vm44_vm0, %v52_v1  ;;  %p144_p12 = scmp.lt.s32.totalorder %s143_s21, 9  ;;  %s309_s20 = smov (!%p138_p10, %s307_s20), 9 }
  0x22   :  { %s311_s21 = smov (!%p63_p11, %s143_s21), 0  ;;  %p71_p13 = scmp.gt.s32.totalorder %s274_s22, 0 }
  0x23   :  { %s59_s25 = scalar_lea.vmem [#allocation6], %s309_s20  ;;  %s313_s21 = smov (!%p144_p12, %s311_s21), 9 }
  0x24   :  { %v60_v2 = vld [vmem:[%s59_s25] sm:$0x1]  ;;  %s72_s26 = scalar_select %p71_p13, %s274_s22, 0 }
  0x25   :  { %61 = vst.msk [vmem:[#allocation7 + $0x2] sm:$0x1] %vm44_vm0, %v60_v2  ;;  %p150_p0 = scmp.lt.s32.totalorder %s274_s22, 9  ;;  %s67_s27 = scalar_lea.vmem [#allocation6], %s313_s21 }
  0x26   :  { %v68_v3 = vld [vmem:[%s67_s27] sm:$0x1]  ;;  %p79_p1 = scmp.gt.s32.totalorder %s276_s23, 0  ;;  %p156_p2 = scmp.lt.s32.totalorder %s276_s23, 9 }
  0x27   :  { %69 = vst.msk [vmem:[#allocation7 + $0x3] sm:$0x1] %vm44_vm0, %v68_v3  ;;  %s315_s26 = smov (!%p150_p0, %s72_s26), 9  ;;  %s161_s28 = sld [smem:[#allocation2 + $0x6]] }
  0x28   :  { %s317_s23 = smov (!%p79_p1, %s276_s23), 0  ;;  %s75_s29 = scalar_lea.vmem [#allocation6], %s315_s26 }
  0x29   :  { %v76_v4 = vld [vmem:[%s75_s29] sm:$0x1]  ;;  %s319_s23 = smov (!%p156_p2, %s317_s23), 9  ;;  %s167_s30 = sld [smem:[#allocation2 + $0x7]] }
  0x2a   :  { %77 = vst.msk [vmem:[#allocation7 + $0x4] sm:$0x1] %vm44_vm0, %v76_v4  ;;  %s83_s3 = scalar_lea.vmem [#allocation6], %s319_s23  ;;  %p223_p7 = scmp.ne.s32.totalorder %s109_s5, %s222_s8 }
  0x2b   :  { %v84_v5 = vld [vmem:[%s83_s3] sm:$0x1]  ;;  %p227_p8 = scmp.lt.s32.totalorder %s109_s5, %s109_s5  ;;  %p228_p9 = scmp.lt.s32.totalorder %s222_s8, %s222_s8 }
  0x2c   :  { %85 = vst.msk [vmem:[#allocation7 + $0x5] sm:$0x1] %vm44_vm0, %v84_v5 }
  0x2d   :  { %p87_p3 = scmp.gt.s32.totalorder %s161_s28, 0  ;;  %p162_p4 = scmp.lt.s32.totalorder %s161_s28, 9 }
  0x2e   :  { %p229_p10 = por %p228_p9, %p227_p8 }
  0x2f   :  { %s321_s28 = smov (!%p87_p3, %s161_s28), 0  ;;  %p95_p5 = scmp.gt.s32.totalorder %s167_s30, 0 }
  0x30   :  { %p168_p6 = scmp.lt.s32.totalorder %s167_s30, 9  ;;  %s323_s28 = smov (!%p162_p4, %s321_s28), 9 }
  0x31   :  { %s325_s30 = smov (!%p95_p5, %s167_s30), 0  ;;  %s91_s6 = scalar_lea.vmem [#allocation6], %s323_s28 }
  0x32   :  { %v92_v6 = vld [vmem:[%s91_s6] sm:$0x1]  ;;  %s327_s30 = smov (!%p168_p6, %s325_s30), 9  ;;  %p230_p11 = pnand %p229_p10, %p223_p7 }
  0x33   :  { %93 = vst.msk [vmem:[#allocation7 + $0x6] sm:$0x1] %vm44_vm0, %v92_v6  ;;  %s99_s7 = scalar_lea.vmem [#allocation6], %s327_s30 }
  0x34   :  { %v100_v7 = vld [vmem:[%s99_s7] sm:$0x1] }
  0x35   :  { %101 = vst.msk [vmem:[#allocation7 + $0x7] sm:$0x1] %vm44_vm0, %v100_v7 }
  0x36   :  { %233 = shalt.err (!%p230_p11)
}
  0x37   :  { %111 = dma.vmem_to_hbm [thread:$0]  %s109_s5, 128, %s297_s2, [#allocation4]  }
  0x38   :  { %246 = dma.done.wait [#allocation4], 128  }
  0x39   :  { %247 = vsyncadd [#allocation4], 4294967168 }
  0x3a   :  { %115 = vsyncpa [#allocation3], 1 }
  0x3b   :  { %116 = vsyncpa [#allocation4], 1 }
  0x3c   :  { %117 = vsyncpa [#allocation5], 1 }

</bundles_post_ra>
